<compile_context>
chip_gen: v7x
topology: tpu7x:2x2x1
jax: 0.10.0
libtpu: 0.0.40
codegen_flags: <defaults>
</compile_context>

<pallas_src>
import functools

import jax
import jax.numpy as jnp
from jax.experimental import pallas as pl
from jax.experimental.pallas import tpu as pltpu

_LANES = 128


def _dice_kernel(x_ref, t_ref, inter_ref, union_ref, iacc, uacc, *,
                 num_classes, fold_rows):
    """Grid = (batch, chunk, spatial_steps).

    x_ref:     (1, C, S, 128) logits tile (native dtype; upcast to f32 here)
    t_ref:     (1, 1, S, 128) int32 labels (sentinel == C on padded lanes)
    inter_ref: (1, 1, 1, C)   per-(batch, chunk) intersection partial sums
    union_ref: (1, 1, 1, C)   per-(batch, chunk) prob-sum + one-hot-sum
    iacc/uacc: (C, R, 128)    f32 running accumulators (R = 8 when folding,
                              else R = S)
    """
    h = pl.program_id(2)
    n_h = pl.num_programs(2)
    C = num_classes

    @pl.when(h == 0)
    def _():
        iacc[...] = jnp.zeros_like(iacc)
        uacc[...] = jnp.zeros_like(uacc)

    t = t_ref[0, 0]                                            # (S, 128) int32
    xs = [x_ref[0, c].astype(jnp.float32) for c in range(C)]   # C x (S, 128)

    # Softmax over the channel axis (PyTorch dim=1). Channels are a leading
    # axis, so max / sum are plain VPU ops over full (S, 128) slabs.
    m = xs[0]
    for c in range(1, C):
        m = jnp.maximum(m, xs[c])
    es = [jnp.exp(xc - m) for xc in xs]                        # EUP
    s = es[0]
    for c in range(1, C):
        s = s + es[c]
    # Exact reciprocal keeps the 1e-5 tolerance; the kernel is HBM-bound so
    # the extra VALU cost is hidden (flip approx=True only with a looser tol).
    inv = pl.reciprocal(s, approx=False)                       # (S, 128)

    def fold(v):
        # Fold the spatial tile down to (8, 128) with VPU adds only; the
        # cross-lane (XLU) reduction is deferred to the final grid step.
        if fold_rows is None:
            return v
        return jnp.sum(v.reshape(-1, fold_rows, v.shape[-1]), axis=0)

    # One-hot per class via compare against a compile-time constant.
    # NOTE: out-of-range / sentinel labels yield an all-zero one-hot row
    # (PyTorch's F.one_hot would raise instead).
    for c in range(C):
        p_c = es[c] * inv                                      # softmax prob
        hit = t == c                                           # (S, 128) bool
        iacc[c] += fold(jnp.where(hit, p_c, 0.0))              # p * onehot
        uacc[c] += fold(jnp.where(hit, p_c + 1.0, p_c))        # p + onehot

    @pl.when(h == n_h - 1)
    def _():
        iv = jnp.sum(jnp.sum(iacc[...], axis=-1), axis=-1)     # (C,)
        uv = jnp.sum(jnp.sum(uacc[...], axis=-1), axis=-1)     # (C,)
        inter_ref[0, 0] = iv[None]
        union_ref[0, 0] = uv[None]


def _choose_rows(s_total, target):
    """Spatial-row tile: a multiple of 8 dividing the (possibly padded) row
    count, or the full extent. Returns (tile_rows, padded_total_rows)."""
    target = max(8, min(target, s_total))
    if s_total <= target:
        return s_total, s_total              # whole extent in one step, no pad
    d = (target // 8) * 8
    while d >= 8:
        if s_total % d == 0:
            return d, s_total                # exact divisor -> zero pad copy
        d -= 8
    t = (target // 8) * 8                    # fallback: pad rows to a multiple
    return t, pl.cdiv(s_total, t) * t


def _vmem_budget():
    """Generation-aware scoped-VMEM limit (v5e/v6e: 128 MiB physical, v7x:
    64 MiB) -- never blindly carry a v6e-sized tile onto v7x."""
    try:
        cap = int(pltpu.get_tpu_info().vmem_capacity_bytes)
    except Exception:
        cap = 64 * 1024 * 1024
    return min(cap * 3 // 4, 64 * 1024 * 1024)


def dice_loss(inputs, targets, num_classes, smooth=1.0, *, max_rows=2048):
    """inputs: (N, C, H, W) float logits; targets: (N, H, W) int labels."""
    N, C, H, W = inputs.shape
    assert C == num_classes
    HW = H * W
    x_bytes = inputs.dtype.itemsize

    s_total = pl.cdiv(HW, _LANES)
    vmem_limit = _vmem_budget()
    # Rows per step: double-buffered logits+labels plus a few full-tile f32
    # temporaries must fit well inside half of the scoped-VMEM limit.
    per_row = _LANES * (2 * (C * x_bytes + 4) + 4 * C * 4)
    target_rows = int(min(max_rows, max(8, (vmem_limit // 2) // per_row)))
    s_tile, s_padded = _choose_rows(s_total, target_rows)
    n_hw = s_padded // s_tile

    pad_lanes = s_padded * _LANES - HW

    x = inputs.reshape(N, C, HW)                 # native dtype (bf16 ok)
    t = targets.reshape(N, 1, HW).astype(jnp.int32)
    # TODO(synk): labels could travel as int8 (num_classes < 128) for ~4x less
    # label HBM traffic once int8 (32, 128) sublane tiling of non-full blocks
    # is handled; kept int32 for guaranteed-clean lowering.
    if pad_lanes:
        # Only the ragged case pays a pad copy. Labels get sentinel C (zero
        # one-hot row); logits get exact zeros (uniform softmax), corrected
        # analytically below -- so the kernel needs no per-tile lane mask.
        x = jnp.pad(x, ((0, 0), (0, 0), (0, pad_lanes)))
        t = jnp.pad(t, ((0, 0), (0, 0), (0, pad_lanes)),
                    constant_values=num_classes)
    x = x.reshape(N, C, s_padded, _LANES)        # free relayout when no pad
    t = t.reshape(N, 1, s_padded, _LANES)

    # Give v7x's two TensorCores >= 2 parallel units of work even when N == 1.
    n_chunks = 2 if (N == 1 and n_hw >= 2 and n_hw % 2 == 0) else 1
    n_hw_inner = n_hw // n_chunks

    fold_rows = 8 if (s_tile % 8 == 0 and s_tile > 8) else None
    acc_rows = 8 if fold_rows else s_tile

    kernel = functools.partial(_dice_kernel, num_classes=C, fold_rows=fold_rows)

    def in_map(b, ch, h):
        return (b, 0, ch * n_hw_inner + h, 0)

    def out_map(b, ch, h):
        return (b, ch, 0, 0)

    cost = pl.CostEstimate(
        flops=8 * N * C * s_padded * _LANES,
        transcendentals=N * C * s_padded * _LANES,
        bytes_accessed=N * s_padded * _LANES * (C * x_bytes + 4))

    inter, union = pl.pallas_call(
        kernel,
        out_shape=(jax.ShapeDtypeStruct((N, n_chunks, 1, C), jnp.float32),
                   jax.ShapeDtypeStruct((N, n_chunks, 1, C), jnp.float32)),
        grid=(N, n_chunks, n_hw_inner),
        in_specs=[
            pl.BlockSpec((1, C, s_tile, _LANES), in_map),
            pl.BlockSpec((1, 1, s_tile, _LANES), in_map),
        ],
        out_specs=[
            pl.BlockSpec((1, 1, 1, C), out_map),
            pl.BlockSpec((1, 1, 1, C), out_map),
        ],
        scratch_shapes=[
            pltpu.VMEM((C, acc_rows, _LANES), jnp.float32),  # intersection
            pltpu.VMEM((C, acc_rows, _LANES), jnp.float32),  # union (p + 1hot)
        ],
        compiler_params=pltpu.CompilerParams(
            dimension_semantics=("parallel", "parallel", "arbitrary"),
            vmem_limit_bytes=vmem_limit),
        cost_estimate=cost,
    )(x, t)

    inter = jnp.sum(inter[:, :, 0, :], axis=1)               # (N, C)
    union = jnp.sum(union[:, :, 0, :], axis=1)               # (N, C)
    if pad_lanes:
        # Zero-padded logits contribute a uniform softmax of 1/C per pad pixel
        # to every class's prob-sum; remove that contribution analytically.
        union = union - jnp.float32(pad_lanes) / C
    dice = (2.0 * inter + smooth) / (union + smooth)
    return jnp.mean(1.0 - jnp.mean(dice, axis=1))


def dice_loss_ref(inputs, targets, num_classes, smooth=1.0):
    """Pure-JAX reference mirroring the PyTorch forward."""
    p = jax.nn.softmax(inputs.astype(jnp.float32), axis=1)
    oh = jax.nn.one_hot(targets, num_classes, dtype=jnp.float32)  # (N,H,W,C)
    oh = jnp.transpose(oh, (0, 3, 1, 2))                          # (N,C,H,W)
    inter = jnp.sum(p * oh, axis=(2, 3))
    union = jnp.sum(p, axis=(2, 3)) + jnp.sum(oh, axis=(2, 3))
    dl = 1.0 - jnp.mean((2.0 * inter + smooth) / (union + smooth), axis=1)
    return jnp.mean(dl)


if __name__ == "__main__":
    key = jax.random.PRNGKey(0)
    k1, k2, k3, k4 = jax.random.split(key, 4)

    # Primary case (H*W already 128-aligned -> zero-copy relayout, no mask).
    N, C, H, W = 2, 4, 16, 16
    logits = jax.random.normal(k1, (N, C, H, W), dtype=jnp.float32)
    labels = jax.random.randint(k2, (N, H, W), 0, C, dtype=jnp.int32)
    out = jax.block_until_ready(dice_loss(logits, labels, num_classes=C))
    ref = dice_loss_ref(logits, labels, num_classes=C)
    assert jnp.allclose(out, ref, atol=1e-5, rtol=1e-5), (out, ref)

    # Multi-step accumulation, (8,128) fold path and the N == 1 two-chunk
    # "parallel" split (keeps v7x's second TensorCore busy).
    N2, C2, H2, W2 = 1, 4, 64, 64
    logits2 = jax.random.normal(k3, (N2, C2, H2, W2), dtype=jnp.float32)
    labels2 = jax.random.randint(k4, (N2, H2, W2), 0, C2, dtype=jnp.int32)
    ref2 = dice_loss_ref(logits2, labels2, num_classes=C2)
    out2 = jax.block_until_ready(
        dice_loss(logits2, labels2, num_classes=C2, max_rows=16))
    assert jnp.allclose(out2, ref2, atol=1e-5, rtol=1e-5), (out2, ref2)
    out2b = jax.block_until_ready(
        dice_loss(logits2, labels2, num_classes=C2, max_rows=8))
    assert jnp.allclose(out2b, ref2, atol=1e-5, rtol=1e-5), (out2b, ref2)

    # Ragged tail: H*W not a multiple of 128 -> sentinel labels + analytic
    # union correction (no per-tile mask).
    k5, k6 = jax.random.split(k4)
    N3, C3, H3, W3 = 2, 3, 5, 7
    logits3 = jax.random.normal(k5, (N3, C3, H3, W3), dtype=jnp.float32)
    labels3 = jax.random.randint(k6, (N3, H3, W3), 0, C3, dtype=jnp.int32)
    out3 = jax.block_until_ready(dice_loss(logits3, labels3, num_classes=C3))
    ref3 = dice_loss_ref(logits3, labels3, num_classes=C3)
    assert jnp.allclose(out3, ref3, atol=1e-5, rtol=1e-5), (out3, ref3)

    print("KERNEL_OK")
</pallas_src>

<mosaic_0001>
module attributes {stable_mosaic.version = 11 : i64} {
  func.func @_dice_kernel(%arg0: i32, %arg1: i32, %arg2: i32, %arg3: memref<1x4x2x128xf32, #tpu.memory_space<vmem>>, %arg4: memref<1x1x2x128xi32, #tpu.memory_space<vmem>>, %arg5: memref<1x1x1x4xf32, #tpu.memory_space<vmem>>, %arg6: memref<1x1x1x4xf32, #tpu.memory_space<vmem>>, %arg7: memref<4x2x128xf32, #tpu.memory_space<vmem>>, %arg8: memref<4x2x128xf32, #tpu.memory_space<vmem>>) attributes {dimension_semantics = [#tpu.dimension_semantics<parallel>, #tpu.dimension_semantics<parallel>, #tpu.dimension_semantics<arbitrary>], iteration_bounds = array<i64: 2, 1, 1>, scalar_prefetch = 0 : i64, scratch_operands = 2 : i64, tpu.core_type = #tpu.core_type<tc>, window_params = [{transform_indices = @transform_0, window_bounds = array<i64: 1, 4, 2, 128>}, {transform_indices = @transform_1, window_bounds = array<i64: 1, 1, 2, 128>}, {transform_indices = @transform_2, window_bounds = array<i64: 1, 1, 1, 4>}, {transform_indices = @transform_3, window_bounds = array<i64: 1, 1, 1, 4>}]} {
    %c0_i32 = arith.constant 0 : i32
    %0 = arith.cmpi eq, %arg2, %c0_i32 : i32
    %1 = arith.extui %0 : i1 to i32
    %c0_i32_0 = arith.constant 0 : i32
    %2 = arith.cmpi ne, %1, %c0_i32_0 : i32
    scf.if %2 {
      %cst_75 = arith.constant 0.000000e+00 : f32
      %111 = vector.broadcast %cst_75 : f32 to vector<4x2x128xf32>
      %c0_76 = arith.constant 0 : index
      %c0_77 = arith.constant 0 : index
      %c0_78 = arith.constant 0 : index
      %112 = vector.load %arg7[%c0_76, %c0_77, %c0_78] : memref<4x2x128xf32, #tpu.memory_space<vmem>>, vector<4x2x128xf32>
      tpu.vector_store %arg7[%c0_76, %c0_77, %c0_78], %111 {strides = array<i32>} : memref<4x2x128xf32, #tpu.memory_space<vmem>>, vector<4x2x128xf32>,
      %cst_79 = arith.constant 0.000000e+00 : f32
      %113 = vector.broadcast %cst_79 : f32 to vector<4x2x128xf32>
      %c0_80 = arith.constant 0 : index
      %c0_81 = arith.constant 0 : index
      %c0_82 = arith.constant 0 : index
      %114 = vector.load %arg8[%c0_80, %c0_81, %c0_82] : memref<4x2x128xf32, #tpu.memory_space<vmem>>, vector<4x2x128xf32>
      tpu.vector_store %arg8[%c0_80, %c0_81, %c0_82], %113 {strides = array<i32>} : memref<4x2x128xf32, #tpu.memory_space<vmem>>, vector<4x2x128xf32>,
    } else {
    }
    %c0 = arith.constant 0 : index
    %c0_1 = arith.constant 0 : index
    %c0_2 = arith.constant 0 : index
    %c0_3 = arith.constant 0 : index
    %3 = vector.load %arg4[%c0, %c0_1, %c0_2, %c0_3] : memref<1x1x2x128xi32, #tpu.memory_space<vmem>>, vector<1x1x2x128xi32>
    %4 = vector.shape_cast %3 : vector<1x1x2x128xi32> to vector<2x128xi32>
    %c0_4 = arith.constant 0 : index
    %c0_5 = arith.constant 0 : index
    %c0_6 = arith.constant 0 : index
    %c0_7 = arith.constant 0 : index
    %5 = vector.load %arg3[%c0_4, %c0_5, %c0_6, %c0_7] : memref<1x4x2x128xf32, #tpu.memory_space<vmem>>, vector<1x1x2x128xf32>
    %6 = vector.shape_cast %5 : vector<1x1x2x128xf32> to vector<2x128xf32>
    %c0_8 = arith.constant 0 : index
    %c1 = arith.constant 1 : index
    %c0_9 = arith.constant 0 : index
    %c0_10 = arith.constant 0 : index
    %7 = vector.load %arg3[%c0_8, %c1, %c0_9, %c0_10] : memref<1x4x2x128xf32, #tpu.memory_space<vmem>>, vector<1x1x2x128xf32>
    %8 = vector.shape_cast %7 : vector<1x1x2x128xf32> to vector<2x128xf32>
    %c0_11 = arith.constant 0 : index
    %c2 = arith.constant 2 : index
    %c0_12 = arith.constant 0 : index
    %c0_13 = arith.constant 0 : index
    %9 = vector.load %arg3[%c0_11, %c2, %c0_12, %c0_13] : memref<1x4x2x128xf32, #tpu.memory_space<vmem>>, vector<1x1x2x128xf32>
    %10 = vector.shape_cast %9 : vector<1x1x2x128xf32> to vector<2x128xf32>
    %c0_14 = arith.constant 0 : index
    %c3 = arith.constant 3 : index
    %c0_15 = arith.constant 0 : index
    %c0_16 = arith.constant 0 : index
    %11 = vector.load %arg3[%c0_14, %c3, %c0_15, %c0_16] : memref<1x4x2x128xf32, #tpu.memory_space<vmem>>, vector<1x1x2x128xf32>
    %12 = vector.shape_cast %11 : vector<1x1x2x128xf32> to vector<2x128xf32>
    %13 = arith.maximumf %6, %8 : vector<2x128xf32>
    %14 = arith.maximumf %13, %10 : vector<2x128xf32>
    %15 = arith.maximumf %14, %12 : vector<2x128xf32>
    %16 = arith.subf %6, %15 : vector<2x128xf32>
    %17 = math.exp %16 : vector<2x128xf32>
    %18 = arith.subf %8, %15 : vector<2x128xf32>
    %19 = math.exp %18 : vector<2x128xf32>
    %20 = arith.subf %10, %15 : vector<2x128xf32>
    %21 = math.exp %20 : vector<2x128xf32>
    %22 = arith.subf %12, %15 : vector<2x128xf32>
    %23 = math.exp %22 : vector<2x128xf32>
    %24 = arith.addf %17, %19 : vector<2x128xf32>
    %25 = arith.addf %24, %21 : vector<2x128xf32>
    %26 = arith.addf %25, %23 : vector<2x128xf32>
    %27 = tpu.reciprocal %26 : vector<2x128xf32> -> vector<2x128xf32>
    %28 = arith.mulf %17, %27 : vector<2x128xf32>
    %c0_i32_17 = arith.constant 0 : i32
    %29 = vector.broadcast %c0_i32_17 : i32 to vector<2x128xi32>
    %30 = arith.cmpi eq, %4, %29 : vector<2x128xi32>
    %c0_18 = arith.constant 0 : index
    %c0_19 = arith.constant 0 : index
    %c0_20 = arith.constant 0 : index
    %31 = vector.load %arg7[%c0_18, %c0_19, %c0_20] : memref<4x2x128xf32, #tpu.memory_space<vmem>>, vector<1x2x128xf32>
    %32 = vector.shape_cast %31 : vector<1x2x128xf32> to vector<2x128xf32>
    %cst = arith.constant 0.000000e+00 : f32
    %33 = vector.broadcast %cst : f32 to vector<2x128xf32>
    %34 = arith.select %30, %28, %33 : vector<2x128xi1>, vector<2x128xf32>
    %35 = arith.addf %32, %34 : vector<2x128xf32>
    %c0_21 = arith.constant 0 : index
    %c0_22 = arith.constant 0 : index
    %c0_23 = arith.constant 0 : index
    %36 = vector.load %arg7[%c0_21, %c0_22, %c0_23] : memref<4x2x128xf32, #tpu.memory_space<vmem>>, vector<1x2x128xf32>
    %37 = vector.shape_cast %36 : vector<1x2x128xf32> to vector<2x128xf32>
    %38 = vector.shape_cast %35 : vector<2x128xf32> to vector<1x2x128xf32>
    tpu.vector_store %arg7[%c0_21, %c0_22, %c0_23], %38 {strides = array<i32>} : memref<4x2x128xf32, #tpu.memory_space<vmem>>, vector<1x2x128xf32>,
    %c0_24 = arith.constant 0 : index
    %c0_25 = arith.constant 0 : index
    %c0_26 = arith.constant 0 : index
    %39 = vector.load %arg8[%c0_24, %c0_25, %c0_26] : memref<4x2x128xf32, #tpu.memory_space<vmem>>, vector<1x2x128xf32>
    %40 = vector.shape_cast %39 : vector<1x2x128xf32> to vector<2x128xf32>
    %cst_27 = arith.constant 1.000000e+00 : f32
    %41 = vector.broadcast %cst_27 : f32 to vector<2x128xf32>
    %42 = arith.addf %28, %41 : vector<2x128xf32>
    %43 = arith.select %30, %42, %28 : vector<2x128xi1>, vector<2x128xf32>
    %44 = arith.addf %40, %43 : vector<2x128xf32>
    %c0_28 = arith.constant 0 : index
    %c0_29 = arith.constant 0 : index
    %c0_30 = arith.constant 0 : index
    %45 = vector.load %arg8[%c0_28, %c0_29, %c0_30] : memref<4x2x128xf32, #tpu.memory_space<vmem>>, vector<1x2x128xf32>
    %46 = vector.shape_cast %45 : vector<1x2x128xf32> to vector<2x128xf32>
    %47 = vector.shape_cast %44 : vector<2x128xf32> to vector<1x2x128xf32>
    tpu.vector_store %arg8[%c0_28, %c0_29, %c0_30], %47 {strides = array<i32>} : memref<4x2x128xf32, #tpu.memory_space<vmem>>, vector<1x2x128xf32>,
    %48 = arith.mulf %19, %27 : vector<2x128xf32>
    %c1_i32 = arith.constant 1 : i32
    %49 = vector.broadcast %c1_i32 : i32 to vector<2x128xi32>
    %50 = arith.cmpi eq, %4, %49 : vector<2x128xi32>
    %c1_31 = arith.constant 1 : index
    %c0_32 = arith.constant 0 : index
    %c0_33 = arith.constant 0 : index
    %51 = vector.load %arg7[%c1_31, %c0_32, %c0_33] : memref<4x2x128xf32, #tpu.memory_space<vmem>>, vector<1x2x128xf32>
    %52 = vector.shape_cast %51 : vector<1x2x128xf32> to vector<2x128xf32>
    %cst_34 = arith.constant 0.000000e+00 : f32
    %53 = vector.broadcast %cst_34 : f32 to vector<2x128xf32>
    %54 = arith.select %50, %48, %53 : vector<2x128xi1>, vector<2x128xf32>
    %55 = arith.addf %52, %54 : vector<2x128xf32>
    %c1_35 = arith.constant 1 : index
    %c0_36 = arith.constant 0 : index
    %c0_37 = arith.constant 0 : index
    %56 = vector.load %arg7[%c1_35, %c0_36, %c0_37] : memref<4x2x128xf32, #tpu.memory_space<vmem>>, vector<1x2x128xf32>
    %57 = vector.shape_cast %56 : vector<1x2x128xf32> to vector<2x128xf32>
    %58 = vector.shape_cast %55 : vector<2x128xf32> to vector<1x2x128xf32>
    tpu.vector_store %arg7[%c1_35, %c0_36, %c0_37], %58 {strides = array<i32>} : memref<4x2x128xf32, #tpu.memory_space<vmem>>, vector<1x2x128xf32>,
    %c1_38 = arith.constant 1 : index
    %c0_39 = arith.constant 0 : index
    %c0_40 = arith.constant 0 : index
    %59 = vector.load %arg8[%c1_38, %c0_39, %c0_40] : memref<4x2x128xf32, #tpu.memory_space<vmem>>, vector<1x2x128xf32>
    %60 = vector.shape_cast %59 : vector<1x2x128xf32> to vector<2x128xf32>
    %cst_41 = arith.constant 1.000000e+00 : f32
    %61 = vector.broadcast %cst_41 : f32 to vector<2x128xf32>
    %62 = arith.addf %48, %61 : vector<2x128xf32>
    %63 = arith.select %50, %62, %48 : vector<2x128xi1>, vector<2x128xf32>
    %64 = arith.addf %60, %63 : vector<2x128xf32>
    %c1_42 = arith.constant 1 : index
    %c0_43 = arith.constant 0 : index
    %c0_44 = arith.constant 0 : index
    %65 = vector.load %arg8[%c1_42, %c0_43, %c0_44] : memref<4x2x128xf32, #tpu.memory_space<vmem>>, vector<1x2x128xf32>
    %66 = vector.shape_cast %65 : vector<1x2x128xf32> to vector<2x128xf32>
    %67 = vector.shape_cast %64 : vector<2x128xf32> to vector<1x2x128xf32>
    tpu.vector_store %arg8[%c1_42, %c0_43, %c0_44], %67 {strides = array<i32>} : memref<4x2x128xf32, #tpu.memory_space<vmem>>, vector<1x2x128xf32>,
    %68 = arith.mulf %21, %27 : vector<2x128xf32>
    %c2_i32 = arith.constant 2 : i32
    %69 = vector.broadcast %c2_i32 : i32 to vector<2x128xi32>
    %70 = arith.cmpi eq, %4, %69 : vector<2x128xi32>
    %c2_45 = arith.constant 2 : index
    %c0_46 = arith.constant 0 : index
    %c0_47 = arith.constant 0 : index
    %71 = vector.load %arg7[%c2_45, %c0_46, %c0_47] : memref<4x2x128xf32, #tpu.memory_space<vmem>>, vector<1x2x128xf32>
    %72 = vector.shape_cast %71 : vector<1x2x128xf32> to vector<2x128xf32>
    %cst_48 = arith.constant 0.000000e+00 : f32
    %73 = vector.broadcast %cst_48 : f32 to vector<2x128xf32>
    %74 = arith.select %70, %68, %73 : vector<2x128xi1>, vector<2x128xf32>
    %75 = arith.addf %72, %74 : vector<2x128xf32>
    %c2_49 = arith.constant 2 : index
    %c0_50 = arith.constant 0 : index
    %c0_51 = arith.constant 0 : index
    %76 = vector.load %arg7[%c2_49, %c0_50, %c0_51] : memref<4x2x128xf32, #tpu.memory_space<vmem>>, vector<1x2x128xf32>
    %77 = vector.shape_cast %76 : vector<1x2x128xf32> to vector<2x128xf32>
    %78 = vector.shape_cast %75 : vector<2x128xf32> to vector<1x2x128xf32>
    tpu.vector_store %arg7[%c2_49, %c0_50, %c0_51], %78 {strides = array<i32>} : memref<4x2x128xf32, #tpu.memory_space<vmem>>, vector<1x2x128xf32>,
    %c2_52 = arith.constant 2 : index
    %c0_53 = arith.constant 0 : index
    %c0_54 = arith.constant 0 : index
    %79 = vector.load %arg8[%c2_52, %c0_53, %c0_54] : memref<4x2x128xf32, #tpu.memory_space<vmem>>, vector<1x2x128xf32>
    %80 = vector.shape_cast %79 : vector<1x2x128xf32> to vector<2x128xf32>
    %cst_55 = arith.constant 1.000000e+00 : f32
    %81 = vector.broadcast %cst_55 : f32 to vector<2x128xf32>
    %82 = arith.addf %68, %81 : vector<2x128xf32>
    %83 = arith.select %70, %82, %68 : vector<2x128xi1>, vector<2x128xf32>
    %84 = arith.addf %80, %83 : vector<2x128xf32>
    %c2_56 = arith.constant 2 : index
    %c0_57 = arith.constant 0 : index
    %c0_58 = arith.constant 0 : index
    %85 = vector.load %arg8[%c2_56, %c0_57, %c0_58] : memref<4x2x128xf32, #tpu.memory_space<vmem>>, vector<1x2x128xf32>
    %86 = vector.shape_cast %85 : vector<1x2x128xf32> to vector<2x128xf32>
    %87 = vector.shape_cast %84 : vector<2x128xf32> to vector<1x2x128xf32>
    tpu.vector_store %arg8[%c2_56, %c0_57, %c0_58], %87 {strides = array<i32>} : memref<4x2x128xf32, #tpu.memory_space<vmem>>, vector<1x2x128xf32>,
    %88 = arith.mulf %23, %27 : vector<2x128xf32>
    %c3_i32 = arith.constant 3 : i32
    %89 = vector.broadcast %c3_i32 : i32 to vector<2x128xi32>
    %90 = arith.cmpi eq, %4, %89 : vector<2x128xi32>
    %c3_59 = arith.constant 3 : index
    %c0_60 = arith.constant 0 : index
    %c0_61 = arith.constant 0 : index
    %91 = vector.load %arg7[%c3_59, %c0_60, %c0_61] : memref<4x2x128xf32, #tpu.memory_space<vmem>>, vector<1x2x128xf32>
    %92 = vector.shape_cast %91 : vector<1x2x128xf32> to vector<2x128xf32>
    %cst_62 = arith.constant 0.000000e+00 : f32
    %93 = vector.broadcast %cst_62 : f32 to vector<2x128xf32>
    %94 = arith.select %90, %88, %93 : vector<2x128xi1>, vector<2x128xf32>
    %95 = arith.addf %92, %94 : vector<2x128xf32>
    %c3_63 = arith.constant 3 : index
    %c0_64 = arith.constant 0 : index
    %c0_65 = arith.constant 0 : index
    %96 = vector.load %arg7[%c3_63, %c0_64, %c0_65] : memref<4x2x128xf32, #tpu.memory_space<vmem>>, vector<1x2x128xf32>
    %97 = vector.shape_cast %96 : vector<1x2x128xf32> to vector<2x128xf32>
    %98 = vector.shape_cast %95 : vector<2x128xf32> to vector<1x2x128xf32>
    tpu.vector_store %arg7[%c3_63, %c0_64, %c0_65], %98 {strides = array<i32>} : memref<4x2x128xf32, #tpu.memory_space<vmem>>, vector<1x2x128xf32>,
    %c3_66 = arith.constant 3 : index
    %c0_67 = arith.constant 0 : index
    %c0_68 = arith.constant 0 : index
    %99 = vector.load %arg8[%c3_66, %c0_67, %c0_68] : memref<4x2x128xf32, #tpu.memory_space<vmem>>, vector<1x2x128xf32>
    %100 = vector.shape_cast %99 : vector<1x2x128xf32> to vector<2x128xf32>
    %cst_69 = arith.constant 1.000000e+00 : f32
    %101 = vector.broadcast %cst_69 : f32 to vector<2x128xf32>
    %102 = arith.addf %88, %101 : vector<2x128xf32>
    %103 = arith.select %90, %102, %88 : vector<2x128xi1>, vector<2x128xf32>
    %104 = arith.addf %100, %103 : vector<2x128xf32>
    %c3_70 = arith.constant 3 : index
    %c0_71 = arith.constant 0 : index
    %c0_72 = arith.constant 0 : index
    %105 = vector.load %arg8[%c3_70, %c0_71, %c0_72] : memref<4x2x128xf32, #tpu.memory_space<vmem>>, vector<1x2x128xf32>
    %106 = vector.shape_cast %105 : vector<1x2x128xf32> to vector<2x128xf32>
    %107 = vector.shape_cast %104 : vector<2x128xf32> to vector<1x2x128xf32>
    tpu.vector_store %arg8[%c3_70, %c0_71, %c0_72], %107 {strides = array<i32>} : memref<4x2x128xf32, #tpu.memory_space<vmem>>, vector<1x2x128xf32>,
    %c0_i32_73 = arith.constant 0 : i32
    %108 = arith.cmpi eq, %arg2, %c0_i32_73 : i32
    %109 = arith.extui %108 : i1 to i32
    %c0_i32_74 = arith.constant 0 : i32
    %110 = arith.cmpi ne, %109, %c0_i32_74 : i32
    scf.if %110 {
      %c0_75 = arith.constant 0 : index
      %c0_76 = arith.constant 0 : index
      %c0_77 = arith.constant 0 : index
      %111 = vector.load %arg7[%c0_75, %c0_76, %c0_77] : memref<4x2x128xf32, #tpu.memory_space<vmem>>, vector<4x2x128xf32>
      %cst_78 = arith.constant dense<0.000000e+00> : vector<4x2xf32>
      %112 = vector.multi_reduction <add>, %111, %cst_78 [2] : vector<4x2x128xf32> to vector<4x2xf32>
      %cst_79 = arith.constant dense<0.000000e+00> : vector<4xf32>
      %113 = vector.multi_reduction <add>, %112, %cst_79 [1] : vector<4x2xf32> to vector<4xf32>
      %c0_80 = arith.constant 0 : index
      %c0_81 = arith.constant 0 : index
      %c0_82 = arith.constant 0 : index
      %114 = vector.load %arg8[%c0_80, %c0_81, %c0_82] : memref<4x2x128xf32, #tpu.memory_space<vmem>>, vector<4x2x128xf32>
      %cst_83 = arith.constant dense<0.000000e+00> : vector<4x2xf32>
      %115 = vector.multi_reduction <add>, %114, %cst_83 [2] : vector<4x2x128xf32> to vector<4x2xf32>
      %cst_84 = arith.constant dense<0.000000e+00> : vector<4xf32>
      %116 = vector.multi_reduction <add>, %115, %cst_84 [1] : vector<4x2xf32> to vector<4xf32>
      %117 = vector.shape_cast %113 : vector<4xf32> to vector<1x4xf32>
      %c0_85 = arith.constant 0 : index
      %c0_86 = arith.constant 0 : index
      %c0_87 = arith.constant 0 : index
      %c0_88 = arith.constant 0 : index
      %118 = vector.load %arg5[%c0_85, %c0_86, %c0_87, %c0_88] : memref<1x1x1x4xf32, #tpu.memory_space<vmem>>, vector<1x1x1x4xf32>
      %119 = vector.shape_cast %118 : vector<1x1x1x4xf32> to vector<1x4xf32>
      %120 = vector.shape_cast %117 : vector<1x4xf32> to vector<1x1x1x4xf32>
      tpu.vector_store %arg5[%c0_85, %c0_86, %c0_87, %c0_88], %120 {strides = array<i32>} : memref<1x1x1x4xf32, #tpu.memory_space<vmem>>, vector<1x1x1x4xf32>,
      %121 = vector.shape_cast %116 : vector<4xf32> to vector<1x4xf32>
      %c0_89 = arith.constant 0 : index
      %c0_90 = arith.constant 0 : index
      %c0_91 = arith.constant 0 : index
      %c0_92 = arith.constant 0 : index
      %122 = vector.load %arg6[%c0_89, %c0_90, %c0_91, %c0_92] : memref<1x1x1x4xf32, #tpu.memory_space<vmem>>, vector<1x1x1x4xf32>
      %123 = vector.shape_cast %122 : vector<1x1x1x4xf32> to vector<1x4xf32>
      %124 = vector.shape_cast %121 : vector<1x4xf32> to vector<1x1x1x4xf32>
      tpu.vector_store %arg6[%c0_89, %c0_90, %c0_91, %c0_92], %124 {strides = array<i32>} : memref<1x1x1x4xf32, #tpu.memory_space<vmem>>, vector<1x1x1x4xf32>,
    } else {
    }
    return
  }
  func.func @transform_0(%arg0: i32, %arg1: i32, %arg2: i32) -> (i32, i32, i32, i32) {
    %c1_i32 = arith.constant 1 : i32
    %0 = arith.muli %arg1, %c1_i32 : i32
    %1 = arith.addi %0, %arg2 : i32
    %c0_i32 = arith.constant 0 : i32
    %c0_i32_0 = arith.constant 0 : i32
    %c0_i32_1 = arith.constant 0 : i32
    return %arg0, %c0_i32, %1, %c0_i32_0 : i32, i32, i32, i32
  }
  func.func @transform_1(%arg0: i32, %arg1: i32, %arg2: i32) -> (i32, i32, i32, i32) {
    %c1_i32 = arith.constant 1 : i32
    %0 = arith.muli %arg1, %c1_i32 : i32
    %1 = arith.addi %0, %arg2 : i32
    %c0_i32 = arith.constant 0 : i32
    %c0_i32_0 = arith.constant 0 : i32
    %c0_i32_1 = arith.constant 0 : i32
    return %arg0, %c0_i32, %1, %c0_i32_0 : i32, i32, i32, i32
  }
  func.func @transform_2(%arg0: i32, %arg1: i32, %arg2: i32) -> (i32, i32, i32, i32) {
    %c0_i32 = arith.constant 0 : i32
    %c0_i32_0 = arith.constant 0 : i32
    %c0_i32_1 = arith.constant 0 : i32
    return %arg0, %arg1, %c0_i32, %c0_i32_0 : i32, i32, i32, i32
  }
  func.func @transform_3(%arg0: i32, %arg1: i32, %arg2: i32) -> (i32, i32, i32, i32) {
    %c0_i32 = arith.constant 0 : i32
    %c0_i32_0 = arith.constant 0 : i32
    %c0_i32_1 = arith.constant 0 : i32
    return %arg0, %arg1, %c0_i32, %c0_i32_0 : i32, i32, i32, i32
  }
}

</mosaic_0001>

<bundles_post_ra>
// kernel: tpu_custom_call.1
= control target key start
LH: loop header
LB: loop body
LE: loop exit
PB: predicated region body
PF: predicated region fallthrough
CT: control target
= control target key end

     0   :  { %9 = vsyncpa [#allocation5], 0  ;;  %s1234_s0 = inlined_call_operand.hbm [shape: f32[2,4,2,128], index: 0, kind: input, shape index: {}]   ;;  %s1235_s1 = inlined_call_operand.hbm [shape: s32[2,1,2,128], index: 1, kind: input, shape index: {}]   ;;  %s1236_s2 = inlined_call_operand.hbm [shape: f32[2,1,1,4], index: 2, kind: output, shape index: {0}]   ;;  %s1237_s3 = inlined_call_operand.hbm [shape: f32[2,1,1,4], index: 3, kind: output, shape index: {1}]  }
   0x1   :  { %11 = vsyncpa [#allocation5 + $0x1], 0 }
   0x2   :  { %12 = vsyncpa [#allocation8], 0 }
   0x3   :  { %14 = vsyncpa [#allocation8 + $0x1], 0 }
   0x4   :  { %15 = vsyncpa [#allocation6], 0 }
   0x5   :  { %17 = vsyncpa [#allocation6 + $0x1], 0 }
   0x6   :  { %18 = vsyncpa [#allocation11], 0 }
   0x7   :  { %20 = vsyncpa [#allocation11 + $0x1], 0  ;;  %s951_s12 = smov 0   ;;  %s953_s13 = smov 0  }
   0x8   :  { %s955_s14 = smov 0   ;;  %s957_s15 = smov 0  }
   0x9   :  { %s959_s16 = smov 0   ;;  %s961_s17 = smov 0  }
   0xa LB: > { %s639_s18 = sadd.s32 4294967295, %s922_s17   ;;  %s640_s19 = sadd.s32 4294967294, %s922_s17   ;;  %s922_s17 = sphi %s961_s17, %s26_s17   ;;  %s918_s16 = sphi %s959_s16, %s1256_s16   ;;  %s914_s15 = sphi %s957_s15, %s1255_s15   ;;  %s910_s14 = sphi %s955_s14, %s1254_s14   ;;  %s906_s13 = sphi %s953_s13, %s1253_s13   ;;  %s902_s12 = sphi %s951_s12, %s1252_s12  }
   0xb   : > { %s45_s20 = sadd.s32 1, %s918_s16  ;;  %s56_s21 = sadd.s32 1, %s910_s14 }
   0xc   : > { %p47_p0 = scmp.ge.s32.totalorder %s45_s20, 2  ;;  %p63_p1 = scmp.ne.s32.totalorder %s910_s14, %s906_s13 }
   0xd   : > { %p64_p2 = scmp.eq.s32.totalorder %s922_s17, 0  ;;  %p69_p3 = scmp.ne.s32.totalorder %s906_s13, %s902_s12 }
   0xe   : > { %s1258_s20 = smov (%p47_p0, %s45_s20), 0  ;;  %p70_p5 = scmp.eq.s32.totalorder %s639_s18, 0 }
   0xf   : > { %p992_p4 = por %p64_p2, %p63_p1  ;;  %s51_s23 = ssub.s32 %s918_s16, %s1258_s20 }
  0x10   : > { %p125_p6 = scmp.eq.s32.totalorder %s639_s18, 1  ;;  %p54_p7 = scmp.eq.s32.totalorder %s51_s23, 0 }
  0x11   : > { %p998_p8 = por %p70_p5, %p69_p3  ;;  %p131_p10 = scmp.eq.s32.totalorder %s640_s19, 1 }
  0x12   : > { %p1002_p9 = por %p125_p6, %p63_p1  ;;  %p681_p13 = scmp.lt.s32.totalorder %s922_s17, 2 }
  0x13   : > { %s1241_s24 = scalar_select %p998_p8, 1, 0 }
  0x14   : > { %s1242_s25 = scalar_select %p1002_p9, 1, 0 }
  0x15   : > { %s1007_s26 = scalar_select %p54_p7, %s910_s14, %s56_s21  }
  0x16   : > { %p1009_p11 = por %p131_p10, %p69_p3  ;;  %s1016_s28 = sand.u32 1, %s910_s14  }
  0x17   : > { %s643_s29 = sshll.u32 %s1016_s28, 3  ;;  %s658_s30 = sshll.u32 %s918_s16, 7 }
  0x18   : > { %s1243_s27 = scalar_select %p1009_p11, 1, 0 }
  0x19   : > { %s1023_s6 = scalar_lea.hbm %s1234_s0, %s658_s30  ;;  %s183_s7 = scalar_lea.vmem [#allocation4], %s643_s29 }
  0x1a   : > { %s192_s8 = sshll.u32 %s183_s7, 4  ;;  %p1029_p0 = pnand %p681_p13, %p992_p4  ;;  %s1025_s8 = int_to_ptr.vmem [resolvable:$true] %s192_s8 }
  0x1b   : > { %s180_s10 = scalar_lea.sflag [#allocation5], %s1016_s28  ;;  %s744_s11 = scalar_lea.hbm %s1023_s6, 128 }
  0x1c   : > { %p745_p2 = scmp.ne.s32.totalorder %s1023_s6, %s744_s11  ;;  %p746_p3 = pneg %p1029_p0 }
  0x1d   : > { %s749_s21 = scalar_lea.hbm %s1234_s0, 256  ;;  %p750_p4 = scmp.lt.u32.totalorder %s1023_s6, %s1234_s0 }
  0x1e   : > { %p747_p5 = pnand %p746_p3, %p745_p2  ;;  %p751_p7 = scmp.lt.u32.totalorder %s749_s21, %s744_s11 }
  0x1f   : > { %p753_p13 = scmp.lt.u32.totalorder %s744_s11, %s1023_s6 }
  0x20   : > { %p748_p6 = pneg %p747_p5  ;;  %p752_p10 = por %p751_p7, %p750_p4 }
  0x22   : > { %p754_p12 = por %p753_p13, %p752_p10 }
  0x24   : > { %p755_p1 = pnand %p754_p12, %p748_p6 }
  0x26   : > { %758 = shalt.err (!%p755_p1)
}
  0x27   : > { %s759_s29 = scalar_lea.vmem %s1025_s8, 128  ;;  %s924_s30 = smov [#allocation4]  }
  0x28   : > { %p760_p2 = scmp.ne.s32.totalorder %s1025_s8, %s759_s29  ;;  %s764_s4 = sshll.u32 %s924_s30, 4  ;;  %s765_s4 = int_to_ptr.vmem [resolvable:$false] %s764_s4 }
  0x29   : > { %s766_s5 = scalar_lea.vmem %s765_s4, 256  ;;  %p767_p9 = scmp.lt.s32.totalorder %s1025_s8, %s765_s4 }
  0x2a   : > { %p762_p5 = pnand %p760_p2, %p746_p3  ;;  %p768_p4 = scmp.lt.s32.totalorder %s766_s5, %s759_s29 }
  0x2c   : > { %p763_p11 = pneg %p762_p5  ;;  %p769_p7 = por %p768_p4, %p767_p9 }
  0x2e   : > { %p770_p10 = pnand %p769_p7, %p763_p11 }
  0x30   : > { %773 = shalt.err (!%p770_p10)
}
  0x31   : > { %s925_s7 = smov 32   ;;  %s926_s11 = smov 2  }
  0x32   : > { %670 = dma.hbm_to_vmem [thread:$0]  (!%p1029_p0), %s1023_s6, 128, %s1025_s8, %s180_s10, %s925_s7, %s925_s7, %s926_s11  }
  0x33   : > { %p220_p12 = scmp.lt.s32.totalorder %s922_s17, 3  ;;  %s646_s18 = sshll.u32 %s1016_s28, 1 }
  0x34   : > { %s647_s19 = sshll.u32 %s918_s16, 5  ;;  %p1245_p9 = scmp.ge.s32.totalorder %s922_s17, 1 }
  0x35   : > { %s1074_s29 = scalar_lea.hbm %s1235_s1, %s647_s19  ;;  %s206_s30 = scalar_lea.vmem [#allocation7], %s646_s18 }
  0x36   : > { %p1067_p11 = pnand %p1245_p9, %p220_p12  ;;  %s215_s4 = sshll.u32 %s206_s30, 4  ;;  %s216_s4 = int_to_ptr.vmem [resolvable:$true] %s215_s4 }
  0x37   : > { %s203_s6 = scalar_lea.sflag [#allocation8], %s1016_s28  ;;  %s774_s8 = scalar_lea.hbm %s1074_s29, 32 }
  0x38   : > { %s1246_s21 = scalar_select %p1067_p11, 1, 0 }
  0x39   : > { %p775_p1 = scmp.ne.s32.totalorder %s1074_s29, %s774_s8  ;;  %s779_s7 = scalar_lea.hbm %s1235_s1, 64 }
  0x3a   : > { %p780_p2 = scmp.lt.u32.totalorder %s1074_s29, %s1235_s1  ;;  %p781_p5 = scmp.lt.u32.totalorder %s779_s7, %s774_s8 }
  0x3b   : > { %p777_p6 = pnand %p775_p1, %p746_p3  ;;  %p783_p7 = scmp.lt.u32.totalorder %s774_s8, %s1074_s29 }
  0x3c   : > { %p782_p4 = por %p781_p5, %p780_p2 }
  0x3d   : > { %p778_p13 = pneg %p777_p6 }
  0x3e   : > { %p784_p10 = por %p783_p7, %p782_p4 }
  0x40   : > { %p785_p12 = pnand %p784_p10, %p778_p13 }
  0x42   : > { %788 = shalt.err (!%p785_p12)
}
  0x43   : > { %s789_s28 = scalar_lea.vmem %s216_s4, 32  ;;  %s927_s18 = smov [#allocation7]  }
  0x44   : > { %p790_p9 = scmp.ne.s32.totalorder %s216_s4, %s789_s28  ;;  %s794_s22 = sshll.u32 %s927_s18, 4  ;;  %s795_s22 = int_to_ptr.vmem [resolvable:$false] %s794_s22 }
  0x45   : > { %s796_s23 = scalar_lea.vmem %s795_s22, 64  ;;  %p797_p8 = scmp.lt.s32.totalorder %s216_s4, %s795_s22 }
  0x46   : > { %p792_p1 = pnand %p790_p9, %p746_p3  ;;  %p798_p11 = scmp.lt.s32.totalorder %s796_s23, %s789_s28 }
  0x48   : > { %p793_p6 = pneg %p792_p1  ;;  %p799_p2 = por %p798_p11, %p797_p8 }
  0x4a   : > { %p800_p5 = pnand %p799_p2, %p793_p6 }
  0x4c   : > { %803 = shalt.err (!%p800_p5)
}
  0x4d   : > { %673 = dma.hbm_to_vmem [thread:$0]  (!%p1029_p0), %s1074_s29, 32, %s216_s4, %s203_s6  }
  0x4e   : > { %p1247_p13 = scmp.ne.s32.totalorder %s1246_s21, 0 }
  0x4f   : > { %s1099_s30 = sand.u32 (!%p1247_p13), 1, %s906_s13   ;;  %p1248_p3 = scmp.ne.s32.totalorder (!%p1247_p13), %s1241_s24, 0 }
  0x50   : > { %224 = sbr.rel (%p1247_p13) target bundleno = 484 (0x1e4), region = 28  ;;  %s649_s8 = sshll.u32 (!%p1247_p13), %s1099_s30, 3 }
  0x51   : > { %s227_s10 = scalar_lea.sflag (!%p1247_p13), [#allocation5], %s1099_s30  ;;  %s230_s5 = scalar_lea.vmem (!%p1247_p13), [#allocation4], %s649_s8 }
  0x57   : > { %885 = dma.done.wait (%p1248_p3), %s227_s10, 128  }
  0x58   : > { %887 = vsyncadd (%p1248_p3), %s227_s10, 4294967168  ;;  %s650_s9 = sshll.u32 %s1099_s30, 1  ;;  %s236_s21 = scalar_lea.sflag [#allocation8], %s1099_s30 }
  0x59   : > { %s1109_s29 = scalar_lea.vmem [#allocation7], %s650_s9 }
  0x5a   : > { %889 = dma.done.wait (%p1248_p3), %s236_s21, 32  }
  0x5b   : > { %891 = vsyncadd (%p1248_p3), %s236_s21, 4294967264  ;;  %v928_v0 = vmov 0.0   ;;  %v285_v1 = vld [vmem:[%s230_s5] sm:$0x3]  ;;  %v651_v2 = vld [vmem:[%s230_s5 + $0x2] sm:$0x3] }
  0x5c   : > { %276 = vst [vmem:[#allocation2] sm:$0x3] %v928_v0  ;;  %277 = vst [vmem:[#allocation2 + $0x2] sm:$0x3] %v928_v0  ;;  %v652_v3 = vld [vmem:[%s230_s5 + $0x4] sm:$0x3]  ;;  %v292_v4 = vmax.f32 %v285_v1, %v651_v2 }
  0x5d   : > { %278 = vst [vmem:[#allocation2 + $0x4] sm:$0x3] %v928_v0  ;;  %279 = vst [vmem:[#allocation2 + $0x6] sm:$0x3] %v928_v0  ;;  %v653_v5 = vld [vmem:[%s230_s5 + $0x6] sm:$0x3] }
  0x5e   : > { %280 = vst [vmem:[#allocation3] sm:$0x3] %v928_v0  ;;  %281 = vst [vmem:[#allocation3 + $0x2] sm:$0x3] %v928_v0  ;;  %v293_v6 = vmax.f32 %v292_v4, %v652_v3  ;;  %v284_v23 = vld [vmem:[%s1109_s29] sm:$0x3] }
  0x5f   : > { %282 = vst [vmem:[#allocation3 + $0x4] sm:$0x3] %v928_v0  ;;  %283 = vst [vmem:[#allocation3 + $0x6] sm:$0x3] %v928_v0  ;;  %vm312_vm0 = vcmp.eq.s32.totalorder %v284_v23, 0  ;;  %vm323_vm1 = vcmp.eq.s32.totalorder %v284_v23, 1 }
  0x60   : > { %v294_v7 = vmax.f32 %v293_v6, %v653_v5  ;;  %vm336_vm2 = vcmp.eq.s32.totalorder %v284_v23, 2  ;;  %vm349_vm3 = vcmp.eq.s32.totalorder %v284_v23, 3  ;;  %vm368_vm4 = vcmask 1041408   ;;  %s654_s24 = sshll.u32 %s914_s15, 4  ;;  %s263_s4 = scalar_lea.vmem [#allocation9], %s1099_s30 }
  0x61   : > { %vm403_vm5 = vcmask 1041409   ;;  %vm405_vm6 = vcmask 1042434   ;;  %vm407_vm7 = vcmask 1043459   ;;  %vm410_vm8 = vcmask 11264   ;;  %s490_s6 = sshll.u32 %s263_s4, 4  ;;  %s269_s7 = scalar_lea.vmem [#allocation10], %s1099_s30  ;;  %s1153_s6 = int_to_ptr.vmem [resolvable:$true] %s490_s6 }
  0x62   : > { %v295_v8 = vsub.f32 %v285_v1, %v294_v7  ;;  %v298_v9 = vsub.f32 %v651_v2, %v294_v7  ;;  %v301_v10 = vsub.f32 %v652_v3, %v294_v7  ;;  %v304_v11 = vsub.f32 %v653_v5, %v294_v7  ;;  %s504_s11 = sshll.u32 %s269_s7, 4  ;;  %s1151_s18 = scalar_lea.hbm %s1236_s2, %s654_s24  ;;  %s1162_s11 = int_to_ptr.vmem [resolvable:$true] %s504_s11 }
  0x63   : > { %v313_v26 = vld [vmem:[#allocation2] sm:$0x3]  ;;  %v325_v29 = vld [vmem:[#allocation2 + $0x2] sm:$0x3]  ;;  %vm463_vm9 = vcmask 24576   ;;  %s1160_s23 = scalar_lea.hbm %s1237_s3, %s654_s24  ;;  %s473_s8 = scalar_lea.sflag [#allocation6], %s1099_s30 }
  0x64   : > { %v296_v12 = vmul.f32 1.442695, %v295_v8  ;;  %v299_v13 = vmul.f32 1.442695, %v298_v9  ;;  %v302_v14 = vmul.f32 1.442695, %v301_v10  ;;  %v385_v9 = vlaneseq }
  0x65   : > { %v305_v15 = vmul.f32 1.442695, %v304_v11  ;;  %v317_v27 = vld [vmem:[#allocation3] sm:$0x3]  ;;  %v330_v32 = vld [vmem:[#allocation3 + $0x2] sm:$0x3] }
  0x66   : > { %734 = vpow2.f32 %v296_v12  ;;  %v338_v33 = vld [vmem:[#allocation2 + $0x4] sm:$0x3]  ;;  %v351_v38 = vld [vmem:[#allocation2 + $0x6] sm:$0x3]  ;;  %v343_v42 = vld [vmem:[#allocation3 + $0x4] sm:$0x3] }
  0x67   : > { %736 = vpow2.f32 %v299_v13  ;;  %v356_v53 = vld [vmem:[#allocation3 + $0x6] sm:$0x3]  ;;  %v386_v12 = vand.u32 127, %v385_v9  ;;  %v388_v13 = vshrl.u32 %v385_v9, 7  ;;  %s804_s10 = scalar_lea.vmem %s1153_s6, 16  ;;  %p1249_p0 = scmp.ne.s32.totalorder %s1242_s25, 0 }
  0x68   : > { %738 = vpow2.f32 %v302_v14  ;;  %p805_p8 = scmp.ne.s32.totalorder %s1153_s6, %s804_s10  ;;  %s929_s5 = smov [#allocation9]  }
  0x69   : > { %740 = vpow2.f32 %v305_v15  ;;  %s808_s9 = sshll.u32 %s929_s5, 4  ;;  %s809_s9 = int_to_ptr.vmem [resolvable:$false] %s808_s9 }
  0x6a   : > { %p806_p11 = pnand %p805_p8, %p1249_p0  ;;  %s810_s21 = scalar_lea.vmem %s809_s9, 32 }
  0x6b   : > { %p811_p7 = scmp.lt.s32.totalorder %s1153_s6, %s809_s9  ;;  %p812_p10 = scmp.lt.s32.totalorder %s810_s21, %s804_s10 }
  0x6c   : > { %p807_p4 = pneg %p806_p11 }
  0x6d   : > { %p813_p12 = por %p812_p10, %p811_p7 }
  0x6f   : > { %p814_p9 = pnand %p813_p12, %p807_p4 }
  0x70   : > { %v735_v16 = vpop.eup %734 }
  0x71   : > { %v737_v17 = vpop.eup %736 }
  0x72   : > { %v739_v18 = vpop.eup %738  ;;  %v307_v19 = vadd.f32 %v737_v17, %v735_v16 }
  0x73   : > { %v741_v20 = vpop.eup %740 }
  0x74   : > { %v308_v21 = vadd.f32 %v739_v18, %v307_v19 }
  0x76   : > { %v309_v22 = vadd.f32 %v741_v20, %v308_v21 }
  0x78   : > { %742 = vrcp.f32 %v309_v22 }
  0x82   : > { %v743_v24 = vpop.eup %742 }
  0x83   : > { %v311_v25 = vmul.f32 %v743_v24, %v735_v16  ;;  %v322_v28 = vmul.f32 %v743_v24, %v737_v17  ;;  %v335_v30 = vmul.f32 %v743_v24, %v739_v18  ;;  %v348_v31 = vmul.f32 %v743_v24, %v741_v20 }
  0x84   : > { %v1132_v16 = vsub.s32 %v386_v12, %v388_v13 }
  0x85   : > { %v314_v34 = vsel %vm312_vm0, %v311_v25, 0.0  ;;  %v318_v35 = vadd.f32 1.0, %v311_v25  ;;  %v326_v36 = vsel %vm323_vm1, %v322_v28, 0.0  ;;  %v331_v37 = vadd.f32 1.0, %v322_v28 }
  0x86   : > { %v315_v39 = vadd.f32 %v314_v34, %v313_v26  ;;  %v327_v40 = vadd.f32 %v326_v36, %v325_v29  ;;  %v339_v41 = vsel %vm336_vm2, %v335_v30, 0.0  ;;  %v344_v43 = vadd.f32 1.0, %v335_v30 }
  0x87   : > { %v319_v44 = vsel %vm312_vm0, %v318_v35, %v311_v25  ;;  %v332_v45 = vsel %vm323_vm1, %v331_v37, %v322_v28  ;;  %v340_v46 = vadd.f32 %v339_v41, %v338_v33  ;;  %v352_v47 = vsel %vm349_vm3, %v348_v31, 0.0 }
  0x88   : > { %316 = vst [vmem:[#allocation2] sm:$0x3] %v315_v39  ;;  %v320_v48 = vadd.f32 %v319_v44, %v317_v27  ;;  %328 = vst [vmem:[#allocation2 + $0x2] sm:$0x3] %v327_v40  ;;  %v333_v49 = vadd.f32 %v332_v45, %v330_v32  ;;  %v345_v50 = vsel %vm336_vm2, %v344_v43, %v335_v30  ;;  %v357_v54 = vadd.f32 1.0, %v348_v31 }
  0x89   : > { %v353_v51 = vadd.f32 %v352_v47, %v351_v38  ;;  %341 = vst [vmem:[#allocation2 + $0x4] sm:$0x3] %v340_v46  ;;  %v346_v52 = vadd.f32 %v345_v50, %v343_v42 }
  0x8a   : > { %321 = vst [vmem:[#allocation3] sm:$0x3] %v320_v48  ;;  %334 = vst [vmem:[#allocation3 + $0x2] sm:$0x3] %v333_v49  ;;  %v358_v55 = vsel %vm349_vm3, %v357_v54, %v348_v31 }
  0x8b   : > { %354 = vst [vmem:[#allocation2 + $0x6] sm:$0x3] %v353_v51  ;;  %347 = vst [vmem:[#allocation3 + $0x4] sm:$0x3] %v346_v52  ;;  %v359_v56 = vadd.f32 %v358_v55, %v356_v53 }
  0x8d   : > { %360 = vst [vmem:[#allocation3 + $0x6] sm:$0x3] %v359_v56 }
  0x8f   : > { %v364_v57 = vld [vmem:[#allocation2] sm:$0x3]  ;;  %v365_v58 = vld [vmem:[#allocation2 + $0x2] sm:$0x3] }
  0x90   : > { %v369_v59 = vsel %vm368_vm4, %v364_v57, 0.0  ;;  %v372_v63 = vsel %vm368_vm4, %v365_v58, 0.0  ;;  %v366_v0 = vld [vmem:[#allocation2 + $0x4] sm:$0x3] }
  0x91   : > { %370 = vadd.xlane.f32.xlu0 %v369_v59  ;;  %v414_v60 = vld [vmem:[#allocation3] sm:$0x3]  ;;  %v415_v61 = vld [vmem:[#allocation3 + $0x2] sm:$0x3]  ;;  %v375_v3 = vsel %vm368_vm4, %v366_v0, 0.0 }
  0x92   : > { %v418_v62 = vsel %vm368_vm4, %v414_v60, 0.0  ;;  %v421_v1 = vsel %vm368_vm4, %v415_v61, 0.0  ;;  %v416_v2 = vld [vmem:[#allocation3 + $0x4] sm:$0x3]  ;;  %v367_v4 = vld [vmem:[#allocation2 + $0x6] sm:$0x3] }
  0x93   : > { %419 = vadd.xlane.f32.xlu1 %v418_v62  ;;  %v424_v5 = vsel %vm368_vm4, %v416_v2, 0.0  ;;  %v378_v7 = vsel %vm368_vm4, %v367_v4, 0.0 }
  0x94   : > { %v417_v6 = vld [vmem:[#allocation3 + $0x6] sm:$0x3] }
  0x95   : > { %373 = vadd.xlane.f32.xlu0 %v372_v63  ;;  %v427_v8 = vsel %vm368_vm4, %v417_v6, 0.0 }
  0x97   : > { %422 = vadd.xlane.f32.xlu1 %v421_v1 }
  0x99   : > { %376 = vadd.xlane.f32.xlu0 %v375_v3 }
  0x9b   : > { %425 = vadd.xlane.f32.xlu1 %v424_v5 }
  0x9d   : > { %379 = vadd.xlane.f32.xlu0 %v378_v7 }
  0x9f   : > { %428 = vadd.xlane.f32.xlu1 %v427_v8 }
 0x11e   : > { %v371_v10 = vpop.xlane.xlu0 %370 }
 0x11f   : > { %v390_v21 = vrot.slane %v371_v10, %v1132_v16 }
 0x120   : > { %v420_v11 = vpop.xlane.xlu1 %419 }
 0x121   : > { %v437_v25 = vrot.slane %v420_v11, %v1132_v16 }
 0x122   : > { %v374_v14 = vpop.xlane.xlu0 %373 }
 0x123   : > { %v394_v18 = vrot.slane %v374_v14, %v1132_v16 }
 0x124   : > { %v423_v15 = vpop.xlane.xlu1 %422 }
 0x125   : > { %v441_v22 = vrot.slane %v423_v15, %v1132_v16  ;;  %v404_v26 = vsel %vm403_vm5, %v394_v18, %v390_v21 }
 0x126   : > { %v377_v17 = vpop.xlane.xlu0 %376 }
 0x127   : > { %v398_v19 = vrot.slane %v377_v17, %v1132_v16  ;;  %v450_v30 = vsel %vm403_vm5, %v441_v22, %v437_v25 }
 0x128   : > { %v426_v20 = vpop.xlane.xlu1 %425 }
 0x129   : > { %v445_v23 = vrot.slane %v426_v20, %v1132_v16  ;;  %v406_v29 = vsel %vm405_vm6, %v398_v19, %v404_v26 }
 0x12a   : > { %v380_v24 = vpop.xlane.xlu0 %379 }
 0x12b   : > { %v402_v27 = vrot.slane %v380_v24, %v1132_v16  ;;  %v451_v34 = vsel %vm405_vm6, %v445_v23, %v450_v30 }
 0x12c   : > { %v429_v28 = vpop.xlane.xlu1 %428 }
 0x12d   : > { %v449_v31 = vrot.slane %v429_v28, %v1132_v16  ;;  %v408_v32 = vsel %vm407_vm7, %v402_v27, %v406_v29 }
 0x12e   : > { %v411_v33 = vsel %vm410_vm8, %v408_v32, 0.0 }
 0x12f   : > { %412 = vadd.xlane.f32.xlu0 %v411_v33  ;;  %v452_v35 = vsel %vm407_vm7, %v449_v31, %v451_v34 }
 0x130   : > { %v454_v36 = vsel %vm410_vm8, %v452_v35, 0.0 }
 0x131   : > { %455 = vadd.xlane.f32.xlu1 %v454_v36 }
 0x1bc   : > { %v413_v37 = vpop.xlane.xlu0 %412 }
 0x1bd   : > { %v461_v38 = vrot.slane %v413_v37, %v1132_v16 }
 0x1be   : > { %v456_v39 = vpop.xlane.xlu1 %455 }
 0x1bf   : > { %v469_v40 = vrot.slane %v456_v39, %v1132_v16  ;;  %464 = vst.msk [vmem:[%s263_s4] sm:$0x1] %vm463_vm9, %v461_v38 }
 0x1c0   : > { %817 = shalt.err (!%p814_p9)
}
 0x1c1   : > { %s818_s29 = scalar_lea.hbm %s1151_s18, 16  ;;  %s822_s19 = scalar_lea.hbm %s1236_s2, 32 }
 0x1c2   : > { %p819_p1 = scmp.ne.s32.totalorder %s1151_s18, %s818_s29  ;;  %p823_p5 = scmp.lt.u32.totalorder %s1151_s18, %s1236_s2 }
 0x1c3   : > { %p824_p13 = scmp.lt.u32.totalorder %s822_s19, %s818_s29  ;;  %p826_p8 = scmp.lt.u32.totalorder %s818_s29, %s1151_s18 }
 0x1c4   : > { %p820_p6 = pnand %p819_p1, %p1249_p0 }
 0x1c5   : > { %p825_p3 = por %p824_p13, %p823_p5 }
 0x1c6   : > { %p821_p2 = pneg %p820_p6 }
 0x1c7   : > { %p827_p11 = por %p826_p8, %p825_p3 }
 0x1c9   : > { %p828_p4 = pnand %p827_p11, %p821_p2 }
 0x1cb   : > { %831 = shalt.err (!%p828_p4)
}
 0x1cc   : > { %663 = dma.vmem_to_hbm [thread:$0]  (%p1249_p0), %s1153_s6, 16, %s1151_s18, %s473_s8   ;;  %471 = vst.msk [vmem:[%s269_s7] sm:$0x1] %vm463_vm9, %v469_v40 }
 0x1cd   : > { %s477_s22 = scalar_lea.sflag [#allocation11], %s1099_s30  ;;  %s832_s10 = scalar_lea.vmem %s1162_s11, 16 }
 0x1ce   : > { %p833_p7 = scmp.ne.s32.totalorder %s1162_s11, %s832_s10  ;;  %s930_s5 = smov [#allocation10]  }
 0x1cf   : > { %s836_s9 = sshll.u32 %s930_s5, 4  ;;  %s837_s9 = int_to_ptr.vmem [resolvable:$false] %s836_s9 }
 0x1d0   : > { %p834_p10 = pnand %p833_p7, %p1249_p0  ;;  %s838_s21 = scalar_lea.vmem %s837_s9, 32 }
 0x1d1   : > { %p839_p9 = scmp.lt.s32.totalorder %s1162_s11, %s837_s9  ;;  %p840_p1 = scmp.lt.s32.totalorder %s838_s21, %s832_s10 }
 0x1d2   : > { %p835_p12 = pneg %p834_p10 }
 0x1d3   : > { %p841_p6 = por %p840_p1, %p839_p9 }
 0x1d5   : > { %p842_p2 = pnand %p841_p6, %p835_p12 }
 0x1d7   : > { %845 = shalt.err (!%p842_p2)
}
 0x1d8   : > { %s846_s30 = scalar_lea.hbm %s1160_s23, 16  ;;  %s850_s18 = scalar_lea.hbm %s1237_s3, 32 }
 0x1d9   : > { %p847_p5 = scmp.ne.s32.totalorder %s1160_s23, %s846_s30  ;;  %p851_p8 = scmp.lt.u32.totalorder %s1160_s23, %s1237_s3 }
 0x1da   : > { %p852_p11 = scmp.lt.u32.totalorder %s850_s18, %s846_s30  ;;  %p854_p7 = scmp.lt.u32.totalorder %s846_s30, %s1160_s23 }
 0x1db   : > { %p848_p13 = pnand %p847_p5, %p1249_p0 }
 0x1dc   : > { %p853_p4 = por %p852_p11, %p851_p8 }
 0x1dd   : > { %p849_p3 = pneg %p848_p13 }
 0x1de   : > { %p855_p10 = por %p854_p7, %p853_p4 }
 0x1e0   : > { %p856_p12 = pnand %p855_p10, %p849_p3 }
 0x1e2   : > { %859 = shalt.err (!%p856_p12)
}
 0x1e3   : > { %664 = dma.vmem_to_hbm [thread:$0]  (%p1249_p0), %s1162_s11, 16, %s1160_s23, %s477_s22  }
 0x1e4 PF: > { %s516_s24 = sand.u32 1, %s902_s12   ;;  %p1250_p9 = scmp.ne.s32.totalorder %s1243_s27, 0 }
 0x1e5   : > { %p1251_p1 = scmp.ge.s32.totalorder %s922_s17, 2  ;;  %s517_s4 = scalar_lea.sflag [#allocation6], %s516_s24 }
 0x1e7   : > { %p675_p6 = pnand %p1251_p1, %p1250_p9 }
 0x1e9   : > { %893 = dma.done.wait (!%p675_p6), %s517_s4, 16  }
 0x1ea   : > { %895 = vsyncadd (!%p675_p6), %s517_s4, 4294967280  ;;  %s525_s19 = scalar_lea.sflag [#allocation11], %s516_s24 }
 0x1eb   : > { %897 = dma.done.wait (!%p675_p6), %s525_s19, 16  }
 0x1ec   : > { %899 = vsyncadd (!%p675_p6), %s525_s19, 4294967280  ;;  %s26_s17 = sadd.s32 1, %s922_s17   ;;  %s1252_s12 = smov %s906_s13 }
 0x1ed   : > { %p23_p2 = scmp.ge.s32.totalorder %s26_s17, 4   ;;  %s1253_s13 = smov %s910_s14 }
 0x1ee   : > { %s1254_s14 = smov %s1007_s26  ;;  %s1255_s15 = smov %s918_s16 }
 0x1ef   : > { %s1256_s16 = smov %s1258_s20  ;;  %25 = sbr.rel (!%p23_p2) target bundleno = 10 (0xa), region = 120 }
 0x1f6   :  { %529 = vsyncpa [#allocation5], 1 }
 0x1f7   :  { %531 = vsyncpa [#allocation5 + $0x1], 1 }
 0x1f8   :  { %532 = vsyncpa [#allocation8], 1 }
 0x1f9   :  { %534 = vsyncpa [#allocation8 + $0x1], 1 }
 0x1fa   :  { %535 = vsyncpa [#allocation6], 1 }
 0x1fb   :  { %537 = vsyncpa [#allocation6 + $0x1], 1 }
 0x1fc   :  { %538 = vsyncpa [#allocation11], 1 }
 0x1fd   :  { %540 = vsyncpa [#allocation11 + $0x1], 1 }

</bundles_post_ra>
